<compile_context>
chip_gen: v7x
topology: tpu7x:2x2x1
jax: 0.10.0
libtpu: 0.0.40
codegen_flags: <defaults>
</compile_context>

<pallas_src>
import functools

import numpy as np
import jax
import jax.numpy as jnp
from jax import lax
from jax.experimental import pallas as pl
from jax.experimental.pallas import tpu as pltpu

_VMEM_LIMIT = 32 << 20  # > v5e default (16 MiB), <= v7x physical VMEM (64 MiB)


def _sigmoid(v):
    # exp lands on the EUP slot; exact reciprocal keeps the kernel tight vs. the
    # f32 reference (both passes are DMA-bound, approx gives no wall-clock win).
    return pl.reciprocal(1.0 + jnp.exp(-v), approx=False)


def _cse_mlp(pooled, w1t_ref, b1_ref, w2_ref, b2_ref):
    """Tiny squeeze MLP on the pooled (C, 1) vector -> sigmoid channel gate (C, 1).

    Broadcast-mul + reduce form (exact f32, avoids degenerate tiny matmuls).
    """
    h = jnp.sum(w1t_ref[...] * pooled, axis=0, keepdims=True) + b1_ref[...]    # (1, mid)
    h = jnp.maximum(h, 0.0)
    z = jnp.sum(w2_ref[...] * h, axis=1, keepdims=True) + b2_ref[...]          # (C, 1)
    return _sigmoid(z)


# ------------------------- fused single-pass kernel -------------------------
def _fused_scse_kernel(inv_hw, x_ref, w1t_ref, b1_ref, w2_ref, b2_ref,
                       ws_ref, bs_ref, o_ref):
    """Whole-batch-element SCSE, resident in VMEM (one read of x, one write).

    x_ref : (1, C, L)  o_ref : (1, C, L)
    w1t   : (C, mid)   b1 : (1, mid)   w2 : (C, mid)   b2 : (C, 1)
    ws    : (C, 1)     bs : (1,) SMEM scalar
    """
    x = x_ref[0].astype(jnp.float32)                                   # (C, L)
    pooled = jnp.sum(x, axis=-1, keepdims=True) * inv_hw               # (C, 1)
    cgate = _cse_mlp(pooled, w1t_ref, b1_ref, w2_ref, b2_ref)          # (C, 1)
    # sSE 1x1 conv (channel reduce). Kept on the VPU for exact f32 numerics;
    # on v7x this could move to the MXU as a (1,C)@(C,L) dot if VPU co-critical.
    s = jnp.sum(x * ws_ref[...], axis=0, keepdims=True) + bs_ref[0]    # (1, L)
    o_ref[0] = (x * (cgate + _sigmoid(s))).astype(o_ref.dtype)


# --------------------- tiled path: pass 1a (partial sums) --------------------
def _partial_sum_kernel(L, TL, tiles_per_chunk, x_ref, o_ref, acc_ref):
    """Per-(batch, chunk) spatial sum accumulated in a VMEM scratch.

    x_ref : (1, C, TL) tile   o_ref : (1, 1, C, 1)   acc_ref : (C, 1) f32 scratch
    """
    t = pl.program_id(2)

    @pl.when(t == 0)
    def _():
        acc_ref[...] = jnp.zeros_like(acc_ref)

    # Mask lanes past the end of the image (ragged last tile) and whole overshoot
    # tiles introduced by the chunk split (their index_map is clamped).
    start = (pl.program_id(1) * tiles_per_chunk + t) * TL
    x = x_ref[0].astype(jnp.float32)                                   # (C, TL)
    lane = lax.broadcasted_iota(jnp.int32, x.shape, 1)
    x = jnp.where(lane < (L - start), x, 0.0)
    acc_ref[...] += jnp.sum(x, axis=-1, keepdims=True)

    @pl.when(t == tiles_per_chunk - 1)
    def _():
        o_ref[0, 0] = acc_ref[...]


# ------------------- tiled path: pass 1b (combine + cSE MLP) -----------------
def _finalize_gate_kernel(inv_hw, psum_ref, w1t_ref, b1_ref, w2_ref, b2_ref, o_ref):
    """Combine chunk partial sums and run the cSE MLP.  psum block: (1, n_chunks, C, 1)."""
    pooled = jnp.sum(psum_ref[0], axis=0) * inv_hw                     # (C, 1)
    o_ref[0] = _cse_mlp(pooled, w1t_ref, b1_ref, w2_ref, b2_ref)


# ---------------------- tiled path: pass 2 (apply gates) ---------------------
def _apply_kernel(x_ref, cgate_ref, ws_ref, bs_ref, o_ref):
    """out = x * (cSE_gate + sigmoid(sSE conv)) for one (batch, spatial-tile) block.

    x_ref : (1, C, TL)   cgate_ref : (1, C, 1)   ws : (C, 1)   bs : (1,) SMEM
    """
    x = x_ref[0].astype(jnp.float32)                                   # (C, TL)
    s = jnp.sum(x * ws_ref[...], axis=0, keepdims=True) + bs_ref[0]    # (1, TL)
    o_ref[0] = (x * (cgate_ref[0] + _sigmoid(s))).astype(o_ref.dtype)


# ----------------------------------- wrapper ---------------------------------
def _pick_tile_l(L, c, budget_bytes):
    """Largest multiple-of-128 lane tile with c*TL*4 bytes <= budget (>=128, <= padded L)."""
    l_pad = ((L + 127) // 128) * 128
    cols = max(budget_bytes // (c * 128 * 4), 1)
    return int(min(cols * 128, l_pad))


def scse_forward(x, params, *,
                 tile_budget_bytes=3 << 20,
                 fused_budget_bytes=28 << 20):
    """SCSEModule forward. x: (N, C, H, W) NCHW as in PyTorch. Output dtype == x.dtype."""
    N, C, H, W = x.shape
    mid = params["w1"].shape[0]
    L = H * W
    inv_hw = 1.0 / float(L)

    xr = x.reshape(N, C, L)                          # free reshape, dtype preserved

    w1t = params["w1"].T.astype(jnp.float32)         # (C, mid)
    b1 = params["b1"].reshape(1, mid).astype(jnp.float32)
    w2 = params["w2"].astype(jnp.float32)            # (C, mid)
    b2 = params["b2"].reshape(C, 1).astype(jnp.float32)
    ws = params["ws"].reshape(C, 1).astype(jnp.float32)
    bs = params["bs"].reshape(1).astype(jnp.float32)

    slab_in = C * L * x.dtype.itemsize
    slab_f32 = C * L * 4
    # in/out double-buffered (4 slabs) + f32 elementwise temporaries (~3 slabs) + slack.
    fused_need = 4 * slab_in + 3 * slab_f32 + (1 << 20)

    if fused_need <= fused_budget_bytes:
        # ---------- fused single-pass path: read x once, write out once ----------
        out = pl.pallas_call(
            functools.partial(_fused_scse_kernel, inv_hw),
            out_shape=jax.ShapeDtypeStruct((N, C, L), x.dtype),
            grid=(N,),
            in_specs=[
                pl.BlockSpec((1, C, L), lambda n: (n, 0, 0)),
                pl.BlockSpec((C, mid), lambda n: (0, 0)),
                pl.BlockSpec((1, mid), lambda n: (0, 0)),
                pl.BlockSpec((C, mid), lambda n: (0, 0)),
                pl.BlockSpec((C, 1), lambda n: (0, 0)),
                pl.BlockSpec((C, 1), lambda n: (0, 0)),
                pl.BlockSpec(memory_space=pltpu.MemorySpace.SMEM),
            ],
            out_specs=pl.BlockSpec((1, C, L), lambda n: (n, 0, 0)),
            compiler_params=pltpu.CompilerParams(
                dimension_semantics=("parallel",),
                vmem_limit_bytes=_VMEM_LIMIT),
        )(xr, w1t, b1, w2, b2, ws, bs)
        return out.reshape(N, C, H, W)

    # -------- tiled three-kernel path (per-batch slab too large for VMEM) --------
    TL = _pick_tile_l(L, C, tile_budget_bytes)
    n_tiles = (L + TL - 1) // TL
    # Split the reduction into 2 'parallel' chunks so both v7x TensorCores stream x
    # even at batch size 1 (harmless on 1-TC v5e/v6e).
    n_chunks = 2 if n_tiles >= 2 else 1
    tpc = (n_tiles + n_chunks - 1) // n_chunks       # tiles per chunk (ceil)

    # Pass 1a: per-(n, chunk) spatial sums (masked ragged / overshoot tiles).
    psum = pl.pallas_call(
        functools.partial(_partial_sum_kernel, L, TL, tpc),
        out_shape=jax.ShapeDtypeStruct((N, n_chunks, C, 1), jnp.float32),
        grid=(N, n_chunks, tpc),
        in_specs=[pl.BlockSpec(
            (1, C, TL),
            lambda n, c, t: (n, 0, jnp.minimum(c * tpc + t, n_tiles - 1)))],
        out_specs=pl.BlockSpec((1, 1, C, 1), lambda n, c, t: (n, c, 0, 0)),
        scratch_shapes=[pltpu.VMEM((C, 1), jnp.float32)],
        compiler_params=pltpu.CompilerParams(
            dimension_semantics=("parallel", "parallel", "arbitrary"),
            vmem_limit_bytes=_VMEM_LIMIT),
    )(xr)

    # Pass 1b: combine chunk sums + cSE MLP -> per-(n, c) gate (tiny).
    cgate = pl.pallas_call(
        functools.partial(_finalize_gate_kernel, inv_hw),
        out_shape=jax.ShapeDtypeStruct((N, C, 1), jnp.float32),
        grid=(N,),
        in_specs=[
            pl.BlockSpec((1, n_chunks, C, 1), lambda n: (n, 0, 0, 0)),
            pl.BlockSpec((C, mid), lambda n: (0, 0)),
            pl.BlockSpec((1, mid), lambda n: (0, 0)),
            pl.BlockSpec((C, mid), lambda n: (0, 0)),
            pl.BlockSpec((C, 1), lambda n: (0, 0)),
        ],
        out_specs=pl.BlockSpec((1, C, 1), lambda n: (n, 0, 0)),
        compiler_params=pltpu.CompilerParams(
            dimension_semantics=("parallel",),
            vmem_limit_bytes=_VMEM_LIMIT),
    )(psum, w1t, b1, w2, b2)

    # Pass 2: sSE conv + sigmoids + gated write; fully parallel lane-dense tiles
    # (ragged edge tile handled by Pallas' masked edge store).
    out = pl.pallas_call(
        _apply_kernel,
        out_shape=jax.ShapeDtypeStruct((N, C, L), x.dtype),
        grid=(N, n_tiles),
        in_specs=[
            pl.BlockSpec((1, C, TL), lambda n, t: (n, 0, t)),
            pl.BlockSpec((1, C, 1), lambda n, t: (n, 0, 0)),
            pl.BlockSpec((C, 1), lambda n, t: (0, 0)),
            pl.BlockSpec(memory_space=pltpu.MemorySpace.SMEM),
        ],
        out_specs=pl.BlockSpec((1, C, TL), lambda n, t: (n, 0, t)),
        compiler_params=pltpu.CompilerParams(
            dimension_semantics=("parallel", "parallel"),
            vmem_limit_bytes=_VMEM_LIMIT),
    )(xr, cgate, ws, bs)
    return out.reshape(N, C, H, W)


# ------------------------------ params & reference ------------------------------
def build_scse_params(key, in_channels, reduction=16):
    """Synthetic parameters mirroring SCSEModule.__init__ (1x1 conv spatial dims squeezed)."""
    c = in_channels
    mid = c // reduction
    k = jax.random.split(key, 6)
    return dict(
        w1=jax.random.normal(k[0], (mid, c), jnp.float32) / np.sqrt(c),
        b1=0.1 * jax.random.normal(k[1], (mid,), jnp.float32),
        w2=jax.random.normal(k[2], (c, mid), jnp.float32) / np.sqrt(max(mid, 1)),
        b2=0.1 * jax.random.normal(k[3], (c,), jnp.float32),
        ws=jax.random.normal(k[4], (c,), jnp.float32) / np.sqrt(c),
        bs=0.1 * jax.random.normal(k[5], (1,), jnp.float32),
    )


def scse_ref(x, params):
    """Pure-JAX reference matching the PyTorch SCSEModule forward."""
    xf = x.astype(jnp.float32)
    pooled = jnp.mean(xf, axis=(2, 3))                                          # (N, C)
    h = jnp.maximum(
        jnp.dot(pooled, params["w1"].T, precision=lax.Precision.HIGHEST)
        + params["b1"], 0.0)
    cg = 1.0 / (1.0 + jnp.exp(-(jnp.dot(h, params["w2"].T,
                                        precision=lax.Precision.HIGHEST)
                                + params["b2"])))                               # (N, C)
    s = jnp.einsum("nchw,c->nhw", xf, params["ws"],
                   precision=lax.Precision.HIGHEST) + params["bs"][0]
    sg = 1.0 / (1.0 + jnp.exp(-s))                                              # (N, H, W)
    return (xf * cg[:, :, None, None] + xf * sg[:, None, :, :]).astype(x.dtype)


if __name__ == "__main__":
    key = jax.random.PRNGKey(0)
    # reduction=16 needs C // 16 >= 1, so C=32; H*W = 575 is deliberately NOT a
    # multiple of 128 to exercise the ragged-spatial handling.
    N, C, H, W, reduction = 2, 32, 23, 25, 16
    kx, kp = jax.random.split(key)
    x = jax.random.normal(kx, (N, C, H, W), jnp.float32)
    params = build_scse_params(kp, C, reduction)

    ref = jax.block_until_ready(scse_ref(x, params))

    # 1) Fused single-pass path (per-batch slab fits the VMEM budget).
    fused = jax.jit(lambda xx, pp: scse_forward(xx, pp))
    out_fused = jax.block_until_ready(fused(x, params))
    assert out_fused.shape == x.shape and out_fused.dtype == x.dtype
    np.testing.assert_allclose(np.asarray(out_fused), np.asarray(ref),
                               rtol=1e-3, atol=1e-3)

    # 2) Tiled three-kernel path, forced with tiny budgets so these small shapes
    #    exercise the chunk-split reduction, the ragged last tile and the
    #    clamped/masked overshoot tile.
    tiled = jax.jit(lambda xx, pp: scse_forward(
        xx, pp, tile_budget_bytes=32 * 1024, fused_budget_bytes=0))
    out_tiled = jax.block_until_ready(tiled(x, params))
    assert out_tiled.shape == x.shape and out_tiled.dtype == x.dtype
    np.testing.assert_allclose(np.asarray(out_tiled), np.asarray(ref),
                               rtol=1e-3, atol=1e-3)

    print("KERNEL_OK")
</pallas_src>

<mosaic_0001>
module attributes {stable_mosaic.version = 11 : i64} {
  func.func @_fused_scse_kernel(%arg0: i32, %arg1: memref<1x32x575xf32, #tpu.memory_space<vmem>>, %arg2: memref<32x2xf32, #tpu.memory_space<vmem>>, %arg3: memref<1x2xf32, #tpu.memory_space<vmem>>, %arg4: memref<32x2xf32, #tpu.memory_space<vmem>>, %arg5: memref<32x1xf32, #tpu.memory_space<vmem>>, %arg6: memref<32x1xf32, #tpu.memory_space<vmem>>, %arg7: memref<1xf32, #tpu.memory_space<smem>>, %arg8: memref<1x32x575xf32, #tpu.memory_space<vmem>>) attributes {dimension_semantics = [#tpu.dimension_semantics<parallel>], iteration_bounds = array<i64: 2>, scalar_prefetch = 0 : i64, scratch_operands = 0 : i64, tpu.core_type = #tpu.core_type<tc>, window_params = [{transform_indices = @transform_0, window_bounds = array<i64: 1, 32, 575>}, {pipeline_mode = #tpu.pipeline_mode<synchronous>, transform_indices = @transform_1, window_bounds = array<i64: 32, 2>}, {pipeline_mode = #tpu.pipeline_mode<synchronous>, transform_indices = @transform_2, window_bounds = array<i64: 1, 2>}, {pipeline_mode = #tpu.pipeline_mode<synchronous>, transform_indices = @transform_3, window_bounds = array<i64: 32, 2>}, {pipeline_mode = #tpu.pipeline_mode<synchronous>, transform_indices = @transform_4, window_bounds = array<i64: 32, 1>}, {pipeline_mode = #tpu.pipeline_mode<synchronous>, transform_indices = @transform_5, window_bounds = array<i64: 32, 1>}, {transform_indices = @transform_6, window_bounds = array<i64: 1>}, {transform_indices = @transform_7, window_bounds = array<i64: 1, 32, 575>}]} {
    %c0 = arith.constant 0 : index
    %c0_0 = arith.constant 0 : index
    %c0_1 = arith.constant 0 : index
    %0 = vector.load %arg1[%c0, %c0_0, %c0_1] : memref<1x32x575xf32, #tpu.memory_space<vmem>>, vector<1x32x575xf32>
    %1 = vector.shape_cast %0 : vector<1x32x575xf32> to vector<32x575xf32>
    %cst = arith.constant dense<0.000000e+00> : vector<32xf32>
    %2 = vector.multi_reduction <add>, %1, %cst [1] : vector<32x575xf32> to vector<32xf32>
    %3 = vector.shape_cast %2 : vector<32xf32> to vector<32x1xf32>
    %cst_2 = arith.constant 0.00173913047 : f32
    %4 = vector.broadcast %cst_2 : f32 to vector<32x1xf32>
    %5 = arith.mulf %3, %4 : vector<32x1xf32>
    %c0_3 = arith.constant 0 : index
    %c0_4 = arith.constant 0 : index
    %6 = vector.load %arg2[%c0_3, %c0_4] : memref<32x2xf32, #tpu.memory_space<vmem>>, vector<32x2xf32>
    %7 = vector.broadcast %5 : vector<32x1xf32> to vector<32x2xf32>
    %8 = arith.mulf %6, %7 : vector<32x2xf32>
    %cst_5 = arith.constant dense<0.000000e+00> : vector<2xf32>
    %9 = vector.multi_reduction <add>, %8, %cst_5 [0] : vector<32x2xf32> to vector<2xf32>
    %10 = vector.shape_cast %9 : vector<2xf32> to vector<1x2xf32>
    %c0_6 = arith.constant 0 : index
    %c0_7 = arith.constant 0 : index
    %11 = vector.load %arg3[%c0_6, %c0_7] : memref<1x2xf32, #tpu.memory_space<vmem>>, vector<1x2xf32>
    %12 = arith.addf %10, %11 : vector<1x2xf32>
    %cst_8 = arith.constant 0.000000e+00 : f32
    %13 = vector.broadcast %cst_8 : f32 to vector<1x2xf32>
    %14 = arith.maximumf %12, %13 : vector<1x2xf32>
    %c0_9 = arith.constant 0 : index
    %c0_10 = arith.constant 0 : index
    %15 = vector.load %arg4[%c0_9, %c0_10] : memref<32x2xf32, #tpu.memory_space<vmem>>, vector<32x2xf32>
    %16 = vector.broadcast %14 : vector<1x2xf32> to vector<32x2xf32>
    %17 = arith.mulf %15, %16 : vector<32x2xf32>
    %cst_11 = arith.constant dense<0.000000e+00> : vector<32xf32>
    %18 = vector.multi_reduction <add>, %17, %cst_11 [1] : vector<32x2xf32> to vector<32xf32>
    %19 = vector.shape_cast %18 : vector<32xf32> to vector<32x1xf32>
    %c0_12 = arith.constant 0 : index
    %c0_13 = arith.constant 0 : index
    %20 = vector.load %arg5[%c0_12, %c0_13] : memref<32x1xf32, #tpu.memory_space<vmem>>, vector<32x1xf32>
    %21 = arith.addf %19, %20 : vector<32x1xf32>
    %cst_14 = arith.constant 0.000000e+00 : f32
    %22 = vector.broadcast %cst_14 : f32 to vector<32x1xf32>
    %23 = arith.subf %22, %21 : vector<32x1xf32>
    %24 = math.exp %23 : vector<32x1xf32>
    %cst_15 = arith.constant 1.000000e+00 : f32
    %25 = vector.broadcast %cst_15 : f32 to vector<32x1xf32>
    %26 = arith.addf %25, %24 : vector<32x1xf32>
    %27 = tpu.reciprocal %26 : vector<32x1xf32> -> vector<32x1xf32>
    %c0_16 = arith.constant 0 : index
    %c0_17 = arith.constant 0 : index
    %28 = vector.load %arg6[%c0_16, %c0_17] : memref<32x1xf32, #tpu.memory_space<vmem>>, vector<32x1xf32>
    %29 = vector.broadcast %28 : vector<32x1xf32> to vector<32x575xf32>
    %30 = arith.mulf %1, %29 : vector<32x575xf32>
    %cst_18 = arith.constant dense<0.000000e+00> : vector<575xf32>
    %31 = vector.multi_reduction <add>, %30, %cst_18 [0] : vector<32x575xf32> to vector<575xf32>
    %32 = vector.shape_cast %31 : vector<575xf32> to vector<1x575xf32>
    %c0_19 = arith.constant 0 : index
    %33 = memref.load %arg7[%c0_19] : memref<1xf32, #tpu.memory_space<smem>>
    %34 = vector.broadcast %33 : f32 to vector<1x575xf32>
    %35 = arith.addf %32, %34 : vector<1x575xf32>
    %cst_20 = arith.constant 0.000000e+00 : f32
    %36 = vector.broadcast %cst_20 : f32 to vector<1x575xf32>
    %37 = arith.subf %36, %35 : vector<1x575xf32>
    %38 = math.exp %37 : vector<1x575xf32>
    %cst_21 = arith.constant 1.000000e+00 : f32
    %39 = vector.broadcast %cst_21 : f32 to vector<1x575xf32>
    %40 = arith.addf %39, %38 : vector<1x575xf32>
    %41 = tpu.reciprocal %40 : vector<1x575xf32> -> vector<1x575xf32>
    %42 = vector.broadcast %27 : vector<32x1xf32> to vector<32x575xf32>
    %43 = vector.broadcast %41 : vector<1x575xf32> to vector<32x575xf32>
    %44 = arith.addf %42, %43 : vector<32x575xf32>
    %45 = arith.mulf %1, %44 : vector<32x575xf32>
    %c0_22 = arith.constant 0 : index
    %c0_23 = arith.constant 0 : index
    %c0_24 = arith.constant 0 : index
    %46 = vector.load %arg8[%c0_22, %c0_23, %c0_24] : memref<1x32x575xf32, #tpu.memory_space<vmem>>, vector<1x32x575xf32>
    %47 = vector.shape_cast %46 : vector<1x32x575xf32> to vector<32x575xf32>
    %48 = vector.shape_cast %45 : vector<32x575xf32> to vector<1x32x575xf32>
    tpu.vector_store %arg8[%c0_22, %c0_23, %c0_24], %48 {strides = array<i32>} : memref<1x32x575xf32, #tpu.memory_space<vmem>>, vector<1x32x575xf32>,
    return
  }
  func.func @transform_0(%arg0: i32) -> (i32, i32, i32) {
    %c0_i32 = arith.constant 0 : i32
    %c0_i32_0 = arith.constant 0 : i32
    %c0_i32_1 = arith.constant 0 : i32
    return %arg0, %c0_i32, %c0_i32_0 : i32, i32, i32
  }
  func.func @transform_1(%arg0: i32) -> (i32, i32) {
    %c0_i32 = arith.constant 0 : i32
    %c0_i32_0 = arith.constant 0 : i32
    %c0_i32_1 = arith.constant 0 : i32
    return %c0_i32, %c0_i32_0 : i32, i32
  }
  func.func @transform_2(%arg0: i32) -> (i32, i32) {
    %c0_i32 = arith.constant 0 : i32
    %c0_i32_0 = arith.constant 0 : i32
    %c0_i32_1 = arith.constant 0 : i32
    return %c0_i32, %c0_i32_0 : i32, i32
  }
  func.func @transform_3(%arg0: i32) -> (i32, i32) {
    %c0_i32 = arith.constant 0 : i32
    %c0_i32_0 = arith.constant 0 : i32
    %c0_i32_1 = arith.constant 0 : i32
    return %c0_i32, %c0_i32_0 : i32, i32
  }
  func.func @transform_4(%arg0: i32) -> (i32, i32) {
    %c0_i32 = arith.constant 0 : i32
    %c0_i32_0 = arith.constant 0 : i32
    %c0_i32_1 = arith.constant 0 : i32
    return %c0_i32, %c0_i32_0 : i32, i32
  }
  func.func @transform_5(%arg0: i32) -> (i32, i32) {
    %c0_i32 = arith.constant 0 : i32
    %c0_i32_0 = arith.constant 0 : i32
    %c0_i32_1 = arith.constant 0 : i32
    return %c0_i32, %c0_i32_0 : i32, i32
  }
  func.func @transform_6(%arg0: i32) -> i32 {
    %c0_i32 = arith.constant 0 : i32
    %c0_i32_0 = arith.constant 0 : i32
    return %c0_i32 : i32
  }
  func.func @transform_7(%arg0: i32) -> (i32, i32, i32) {
    %c0_i32 = arith.constant 0 : i32
    %c0_i32_0 = arith.constant 0 : i32
    %c0_i32_1 = arith.constant 0 : i32
    return %arg0, %c0_i32, %c0_i32_0 : i32, i32, i32
  }
}

</mosaic_0001>

<bundles_post_ra>
// kernel: _lambda_.1
= control target key start
LH: loop header
LB: loop body
LE: loop exit
PB: predicated region body
PF: predicated region fallthrough
CT: control target
= control target key end

     0   :  { %s779_s26 = smov 0   ;;  %s1018_s0 = inlined_call_operand.vmem [shape: f32[2,32,575], index: 0, kind: input, shape index: {}]   ;;  %s1019_s1 = inlined_call_operand.vmem [shape: f32[32,2], index: 1, kind: input, shape index: {}]   ;;  %s1020_s2 = inlined_call_operand.vmem [shape: f32[1,2], index: 2, kind: input, shape index: {}]   ;;  %s1021_s3 = inlined_call_operand.vmem [shape: f32[32,2], index: 3, kind: input, shape index: {}]   ;;  %s1022_s4 = inlined_call_operand.vmem [shape: f32[32,1], index: 4, kind: input, shape index: {}]   ;;  %s1023_s5 = inlined_call_operand.vmem [shape: f32[32,1], index: 5, kind: input, shape index: {}]   ;;  %s1024_s6 = inlined_call_operand.<no memory space> [shape: f32[1], index: 6, kind: input, shape index: {}]   ;;  %s1025_s7 = inlined_call_operand.vmem [shape: f32[2,32,575], index: 7, kind: output, shape index: {}]  }
   0x1   :  { %12 = sst [smem:[#allocation2]] %s1024_s6 }
   0x2 LB: > { %s670_s27 = sadd.s32 4294967295, %s733_s26   ;;  %p674_p0 = scmp.ge.s32.totalorder %s733_s26, 1  ;;  %s733_s26 = sphi %s779_s26, %s18_s26  }
   0x3   : > { %p238_p1 = scmp.lt.s32.totalorder %s733_s26, 3 }
   0x5   : > { %p239_p2 = pnand %p674_p0, %p238_p1 }
   0x6   : > { %p270_p3 = scmp.lt.s32.totalorder (!%p239_p2), %s670_s27, 1  ;;  %vm303_vm0 = vcmask (!%p239_p2), 515072   ;;  %v735_v40 = vmov (!%p239_p2), 0   ;;  %v333_v43 = vld [vmem:[%s1019_s1] sm:$0xff] (!%p239_p2)  ;;  %v335_v46 = vld [vmem:[%s1019_s1 + $0x10] sm:$0xff] (!%p239_p2)  ;;  %v334_v47 = vld [vmem:[%s1019_s1 + $0x8] sm:$0xff] (!%p239_p2) }
   0x7   : > { %242 = sbr.rel (%p239_p2) target bundleno = 525 (0x20d), region = 48  ;;  %690 = vset.pattern.permute.xlu1 (!%p239_p2), %v735_v40  ;;  %689 = vset.pattern.permute.xlu0 (!%p239_p2), %v735_v40  ;;  %vm341_vm1 = vcmask (!%p239_p2), 15360   ;;  %v336_v51 = vld [vmem:[%s1019_s1 + $0x18] sm:$0xff] (!%p239_p2)  ;;  %s503_s21 = sld [smem:[#allocation2]] (!%p239_p2) }
   0xe   : > { %s1027_s27 = smov (!%p270_p3, %s670_s27), 1 }
   0xf   : > { %s679_s6 = smul.u32 160, %s1027_s27 }
  0x11   : > { %s795_s30 = scalar_lea.vmem %s1018_s0, %s679_s6  ;;  %s969_s24 = scalar_lea.vmem %s1025_s7, %s679_s6 }
  0x12   : > { %v798_v0 = vld [vmem:[%s795_s30] sm:$0xff]  ;;  %v801_v1 = vld [vmem:[%s795_s30 + $0x8] sm:$0xff]  ;;  %v804_v2 = vld [vmem:[%s795_s30 + $0x10] sm:$0xff] }
  0x13   : > { %v807_v3 = vld [vmem:[%s795_s30 + $0x18] sm:$0xff]  ;;  %v810_v4 = vld [vmem:[%s795_s30 + $0x20] sm:$0xff]  ;;  %v300_v5 = vadd.f32 %v801_v1, %v798_v0  ;;  %v815_v6 = vld [vmem:[%s795_s30 + $0x50] sm:$0xff] }
  0x14   : > { %v818_v7 = vld [vmem:[%s795_s30 + $0x58] sm:$0xff]  ;;  %v821_v8 = vld [vmem:[%s795_s30 + $0x60] sm:$0xff]  ;;  %v824_v9 = vld [vmem:[%s795_s30 + $0x68] sm:$0xff]  ;;  %v304_v15 = vsel %vm303_vm0, %v810_v4, 0.0 }
  0x15   : > { %v301_v10 = vadd.f32 %v300_v5, %v804_v2  ;;  %v828_v11 = vld [vmem:[%s795_s30 + $0x70] sm:$0xff]  ;;  %v315_v12 = vadd.f32 %v818_v7, %v815_v6  ;;  %v833_v13 = vld [vmem:[%s795_s30 + $0x28] sm:$0xff]  ;;  %v841_v16 = vld [vmem:[%s795_s30 + $0x38] sm:$0xff] }
  0x16   : > { %v836_v14 = vld [vmem:[%s795_s30 + $0x30] sm:$0xff]  ;;  %v844_v17 = vld [vmem:[%s795_s30 + $0x40] sm:$0xff]  ;;  %v847_v18 = vld [vmem:[%s795_s30 + $0x48] sm:$0xff]  ;;  %v318_v25 = vsel %vm303_vm0, %v828_v11, 0.0 }
  0x17   : > { %v308_v19 = vadd.f32 %v836_v14, %v833_v13  ;;  %v302_v20 = vadd.f32 %v301_v10, %v807_v3  ;;  %v316_v21 = vadd.f32 %v315_v12, %v821_v8  ;;  %v854_v22 = vld [vmem:[%s795_s30 + $0x78] sm:$0xff]  ;;  %v857_v23 = vld [vmem:[%s795_s30 + $0x80] sm:$0xff]  ;;  %v860_v24 = vld [vmem:[%s795_s30 + $0x88] sm:$0xff]  ;;  %v311_v31 = vsel %vm303_vm0, %v847_v18, 0.0 }
  0x18   : > { %v866_v27 = vld [vmem:[%s795_s30 + $0x98] sm:$0xff]  ;;  %v322_v28 = vadd.f32 %v857_v23, %v854_v22  ;;  %v874_v32 = vld [vmem:[%s795_s30 + $0x90] sm:$0xff] }
  0x19   : > { %v309_v26 = vadd.f32 %v308_v19, %v841_v16  ;;  %v305_v29 = vadd.f32 %v304_v15, %v302_v20  ;;  %v317_v30 = vadd.f32 %v316_v21, %v824_v9  ;;  %v325_v36 = vsel %vm303_vm0, %v866_v27, 0.0 }
  0x1a   : > { %v323_v34 = vadd.f32 %v322_v28, %v860_v24  ;;  %v362_v15 = vlaneseq }
  0x1b   : > { %v310_v33 = vadd.f32 %v309_v26, %v844_v17  ;;  %306 = vadd.xlane.f32.xlu0 %v305_v29  ;;  %v319_v35 = vadd.f32 %v318_v25, %v317_v30  ;;  %v355_v25 = vld [vmem:[%s1020_s2] sm:$0x1] }
  0x1c   : > { %v324_v38 = vadd.f32 %v323_v34, %v874_v32  ;;  %v363_v21 = vshrl.u32 %v362_v15, 7 }
  0x1d   : > { %v312_v37 = vadd.f32 %v311_v31, %v310_v33  ;;  %320 = vadd.xlane.f32.xlu1 %v319_v35  ;;  %v359_v31 = vld [vmem:[%s1021_s3 + $0x8] sm:$0xff]  ;;  %v358_v33 = vld [vmem:[%s1021_s3] sm:$0xff]  ;;  %v361_v35 = vld [vmem:[%s1021_s3 + $0x18] sm:$0xff] }
  0x1e   : > { %v326_v39 = vadd.f32 %v325_v36, %v324_v38  ;;  %v364_v29 = vsub.s32 0, %v363_v21  ;;  %v360_v36 = vld [vmem:[%s1021_s3 + $0x10] sm:$0xff] }
  0x1f   : > { %313 = vadd.xlane.f32.xlu0 %v312_v37 }
  0x21   : > { %327 = vadd.xlane.f32.xlu1 %v326_v39 }
  0xa8   : > { %v307_v41 = vpop.xlane.xlu0 %306 }
  0xa9   : > { %v329_v42 = vmul.f32 0.0017391305, %v307_v41 }
  0xaa   : > { %v321_v44 = vpop.xlane.xlu1 %320 }
  0xab   : > { %v331_v45 = vmul.f32 0.0017391305, %v321_v44  ;;  %v337_v49 = vmul.f32 %v333_v43, %v329_v42 }
  0xac   : > { %v314_v48 = vpop.xlane.xlu0 %313 }
  0xad   : > { %v330_v50 = vmul.f32 0.0017391305, %v314_v48  ;;  %v339_v53 = vmul.f32 %v335_v46, %v331_v45  ;;  %v342_v56 = vsel %vm341_vm1, %v337_v49, 0.0  ;;  %v411_v45 = vld [vmem:[%s1023_s5 + $0x8] sm:$0xff]  ;;  %v412_v46 = vld [vmem:[%s1023_s5 + $0x10] sm:$0xff]  ;;  %v413_v48 = vld [vmem:[%s1023_s5 + $0x18] sm:$0xff] }
  0xae   : > { %v328_v52 = vpop.xlane.xlu1 %327  ;;  %v383_v49 = vld [vmem:[%s1022_s4 + $0x8] sm:$0xff] }
  0xaf   : > { %v338_v54 = vmul.f32 %v334_v47, %v330_v50  ;;  %v332_v55 = vmul.f32 0.0017391305, %v328_v52  ;;  %v345_v60 = vsel %vm341_vm1, %v339_v53, 0.0  ;;  %v410_v47 = vld [vmem:[%s1023_s5] sm:$0xff] }
  0xb0   : > { %v382_v50 = vld [vmem:[%s1022_s4] sm:$0xff] }
  0xb1   : > { %v343_v57 = vsel %vm341_vm1, %v338_v54, 0.0  ;;  %v340_v58 = vmul.f32 %v336_v51, %v332_v55  ;;  %v385_v55 = vld [vmem:[%s1022_s4 + $0x18] sm:$0xff] }
  0xb2   : > { %v344_v59 = vadd.f32 %v343_v57, %v342_v56  ;;  %v384_v56 = vld [vmem:[%s1022_s4 + $0x10] sm:$0xff] }
  0xb3   : > { %v347_v61 = vsel %vm341_vm1, %v340_v58, 0.0 }
  0xb4   : > { %v346_v62 = vadd.f32 %v345_v60, %v344_v59 }
  0xb6   : > { %v348_v63 = vadd.f32 %v347_v61, %v346_v62 }
  0xb8   : > { %v349_v5 = vrot.slane %v348_v63, 4 }
  0xba   : > { %v350_v10 = vadd.f32 %v349_v5, %v348_v63 }
  0xbc   : > { %v351_v12 = vrot.slane %v350_v10, 2 }
  0xbe   : > { %v352_v19 = vadd.f32 %v351_v12, %v350_v10 }
  0xc0   : > { %v353_v20 = vrot.slane %v352_v19, 1 }
  0xc2   : > { %v354_v26 = vadd.f32 %v353_v20, %v352_v19 }
  0xc4   : > { %v356_v28 = vadd.f32 %v355_v25, %v354_v26 }
  0xc6   : > { %v357_v30 = vmax.f32 %v356_v28, 0.0 }
  0xc8   : > { %v365_v34 = vrot.slane %v357_v30, %v364_v29 }
  0xca   : > { %v367_v37 = vmul.f32 %v365_v34, %v359_v31  ;;  %v366_v38 = vmul.f32 %v365_v34, %v358_v33  ;;  %v369_v41 = vmul.f32 %v365_v34, %v361_v35  ;;  %v368_v42 = vmul.f32 %v365_v34, %v360_v36 }
  0xcc   : > { %v373_v39 = vsel %vm341_vm1, %v367_v37, 0.0  ;;  %v370_v40 = vsel %vm341_vm1, %v366_v38, 0.0  ;;  %v379_v43 = vsel %vm341_vm1, %v369_v41, 0.0  ;;  %v376_v44 = vsel %vm341_vm1, %v368_v42, 0.0 }
  0xcd   : > { %374 = vadd.xlane.f32.xlu1 %v373_v39  ;;  %371 = vadd.xlane.f32.xlu0 %v370_v40 }
  0xd1   : > { %380 = vadd.xlane.f32.xlu1 %v379_v43  ;;  %377 = vadd.xlane.f32.xlu0 %v376_v44 }
  0xe2   : > { %421 = vperm.xlu1 %690, %v411_v45  }
  0xe6   : > { %426 = vperm.xlu1 %690, %v412_v46  }
  0xe7   : > { %416 = vperm.xlu0 %689, %v410_v47  }
  0xea   : > { %431 = vperm.xlu1 %690, %v413_v48  }
 0x15a   : > { %v375_v51 = vpop.xlane.xlu1 %374  ;;  %v372_v52 = vpop.xlane.xlu0 %371 }
 0x15b   : > { %v387_v53 = vadd.f32 %v383_v49, %v375_v51  ;;  %v386_v54 = vadd.f32 %v382_v50, %v372_v52 }
 0x15d   : > { %v391_v57 = vsub.f32 0.0, %v387_v53  ;;  %v390_v58 = vsub.f32 0.0, %v386_v54 }
 0x15e   : > { %v381_v59 = vpop.xlane.xlu1 %380  ;;  %v378_v60 = vpop.xlane.xlu0 %377 }
 0x15f   : > { %v396_v61 = vmul.f32 1.442695, %v391_v57  ;;  %v394_v62 = vmul.f32 1.442695, %v390_v58  ;;  %v389_v63 = vadd.f32 %v385_v55, %v381_v59  ;;  %v388_v5 = vadd.f32 %v384_v56, %v378_v60 }
 0x161   : > { %691 = vpow2.f32 %v396_v61  ;;  %v392_v10 = vsub.f32 0.0, %v388_v5  ;;  %v393_v12 = vsub.f32 0.0, %v389_v63 }
 0x162   : > { %693 = vpow2.f32 %v394_v62  ;;  %v422_v37 = vpop.permute.xlu1 %421 }
 0x163   : > { %v398_v15 = vmul.f32 1.442695, %v392_v10  ;;  %v400_v19 = vmul.f32 1.442695, %v393_v12  ;;  %v439_v40 = vmul.f32 %v422_v37, %v833_v13  ;;  %v443_v41 = vmul.f32 %v422_v37, %v847_v18 }
 0x164   : > { %v440_v43 = vmul.f32 %v422_v37, %v836_v14  ;;  %v441_v46 = vmul.f32 %v422_v37, %v841_v16  ;;  %v442_v48 = vmul.f32 %v422_v37, %v844_v17 }
 0x165   : > { %695 = vpow2.f32 %v398_v15  ;;  %v491_v51 = vsel %vm303_vm0, %v443_v41, 0.0 }
 0x166   : > { %697 = vpow2.f32 %v400_v19  ;;  %v417_v38 = vpop.permute.xlu0 %416  ;;  %v427_v39 = vpop.permute.xlu1 %426 }
 0x167   : > { %v434_v42 = vmul.f32 %v417_v38, %v798_v0  ;;  %v435_v44 = vmul.f32 %v417_v38, %v801_v1  ;;  %v438_v45 = vmul.f32 %v417_v38, %v810_v4  ;;  %v436_v47 = vmul.f32 %v417_v38, %v804_v2 }
 0x168   : > { %v437_v49 = vmul.f32 %v417_v38, %v807_v3  ;;  %v444_v50 = vmul.f32 %v427_v39, %v815_v6  ;;  %v445_v53 = vmul.f32 %v427_v39, %v818_v7  ;;  %v448_v54 = vmul.f32 %v427_v39, %v828_v11 }
 0x169   : > { %v454_v52 = vadd.f32 %v439_v40, %v434_v42  ;;  %v463_v55 = vadd.f32 %v440_v43, %v435_v44  ;;  %v490_v56 = vsel %vm303_vm0, %v438_v45, 0.0  ;;  %v446_v58 = vmul.f32 %v427_v39, %v821_v8 }
 0x16a   : > { %v432_v57 = vpop.permute.xlu1 %431  ;;  %v472_v59 = vadd.f32 %v441_v46, %v436_v47  ;;  %v447_v60 = vmul.f32 %v427_v39, %v824_v9  ;;  %v481_v61 = vadd.f32 %v442_v48, %v437_v49  ;;  %v492_v63 = vadd.f32 %v491_v51, %v490_v56 }
 0x16b   : > { %v692_v20 = vpop.eup %691  ;;  %v455_v62 = vadd.f32 %v454_v52, %v444_v50  ;;  %v449_v5 = vmul.f32 %v432_v57, %v854_v22  ;;  %v493_v10 = vsel %vm303_vm0, %v448_v54, 0.0  ;;  %v464_v12 = vadd.f32 %v463_v55, %v445_v53 }
 0x16c   : > { %v694_v21 = vpop.eup %693  ;;  %v403_v26 = vadd.f32 1.0, %v692_v20  ;;  %v450_v15 = vmul.f32 %v432_v57, %v857_v23  ;;  %v453_v19 = vmul.f32 %v432_v57, %v866_v27  ;;  %v473_v20 = vadd.f32 %v472_v59, %v446_v58 }
 0x16d   : > { %v402_v25 = vadd.f32 1.0, %v694_v21  ;;  %v451_v21 = vmul.f32 %v432_v57, %v860_v24 }
 0x16f   : > { %699 = vrcp.f32 %v402_v25  ;;  %v696_v28 = vpop.eup %695  ;;  %v482_v25 = vadd.f32 %v481_v61, %v447_v60 }
 0x170   : > { %701 = vrcp.f32 %v403_v26  ;;  %v404_v29 = vadd.f32 1.0, %v696_v28  ;;  %v698_v30 = vpop.eup %697  ;;  %v452_v26 = vmul.f32 %v432_v57, %v874_v32  ;;  %v494_v28 = vadd.f32 %v493_v10, %v492_v63 }
 0x171   : > { %v405_v31 = vadd.f32 1.0, %v698_v30  ;;  %v465_v30 = vadd.f32 %v464_v12, %v450_v15 }
 0x172   : > { %703 = vrcp.f32 %v404_v29  ;;  %v456_v29 = vadd.f32 %v455_v62, %v449_v5  ;;  %v504_v62 = vstv %s503_s21 }
 0x173   : > { %705 = vrcp.f32 %v405_v31  ;;  %v495_v31 = vsel %vm303_vm0, %v453_v19, 0.0  ;;  %v466_v37 = vrot.slane %v465_v30, 4 }
 0x175   : > { %v467_v42 = vadd.f32 %v466_v37, %v465_v30 }
 0x177   : > { %v468_v47 = vrot.slane %v467_v42, 2 }
 0x179   : > { %v700_v33 = vpop.eup %699  ;;  %v469_v52 = vadd.f32 %v468_v47, %v467_v42 }
 0x17a   : > { %537 = vperm.xlu1 %690, %v700_v33   ;;  %v702_v34 = vpop.eup %701  ;;  %v474_v33 = vadd.f32 %v473_v20, %v451_v21 }
 0x17b   : > { %v470_v57 = vrot.slane %v469_v52, 1 }
 0x17c   : > { %v704_v35 = vpop.eup %703  ;;  %v475_v38 = vrot.slane %v474_v33, 4 }
 0x17d   : > { %v706_v36 = vpop.eup %705  ;;  %v471_v63 = vadd.f32 %v470_v57, %v469_v52 }
 0x17e   : > { %542 = vperm.xlu1 %690, %v702_v34   ;;  %v483_v34 = vadd.f32 %v482_v25, %v452_v26  ;;  %v476_v43 = vadd.f32 %v475_v38, %v474_v33 }
 0x17f   : > { %v506_v19 = vadd.f32 %v504_v62, %v471_v63 }
 0x180   : > { %v484_v39 = vrot.slane %v483_v34, 4  ;;  %v477_v48 = vrot.slane %v476_v43, 2 }
 0x182   : > { %547 = vperm.xlu1 %690, %v704_v35   ;;  %v457_v35 = vrot.slane %v456_v29, 4  ;;  %v485_v44 = vadd.f32 %v484_v39, %v483_v34  ;;  %v478_v53 = vadd.f32 %v477_v48, %v476_v43 }
 0x184   : > { %v458_v40 = vadd.f32 %v457_v35, %v456_v29  ;;  %v486_v49 = vrot.slane %v485_v44, 2  ;;  %v479_v58 = vrot.slane %v478_v53, 1 }
 0x186   : > { %552 = vperm.xlu1 %690, %v706_v36   ;;  %v496_v36 = vadd.f32 %v495_v31, %v494_v28  ;;  %v459_v45 = vrot.slane %v458_v40, 2  ;;  %v487_v54 = vadd.f32 %v486_v49, %v485_v44  ;;  %v480_v5 = vadd.f32 %v479_v58, %v478_v53 }
 0x187   : > { %v511_v28 = vsub.f32 0.0, %v506_v19 }
 0x188   : > { %v497_v41 = vrot.slane %v496_v36, 4  ;;  %v460_v50 = vadd.f32 %v459_v45, %v458_v40  ;;  %v488_v59 = vrot.slane %v487_v54, 1  ;;  %v507_v20 = vadd.f32 %v504_v62, %v480_v5 }
 0x189   : > { %v517_v34 = vmul.f32 1.442695, %v511_v28 }
 0x18a   : > { %v498_v46 = vadd.f32 %v497_v41, %v496_v36  ;;  %v461_v55 = vrot.slane %v460_v50, 1  ;;  %v489_v10 = vadd.f32 %v488_v59, %v487_v54  ;;  %v512_v29 = vsub.f32 0.0, %v507_v20 }
 0x18c   : > { %v499_v51 = vrot.slane %v498_v46, 2  ;;  %v462_v60 = vadd.f32 %v461_v55, %v460_v50  ;;  %v508_v21 = vadd.f32 %v504_v62, %v489_v10  ;;  %v519_v35 = vmul.f32 1.442695, %v512_v29 }
 0x18e   : > { %v500_v56 = vadd.f32 %v499_v51, %v498_v46  ;;  %v505_v15 = vadd.f32 %v504_v62, %v462_v60  ;;  %v513_v30 = vsub.f32 0.0, %v508_v21 }
 0x190   : > { %v501_v61 = vrot.slane %v500_v56, 1  ;;  %v510_v26 = vsub.f32 0.0, %v505_v15  ;;  %v521_v36 = vmul.f32 1.442695, %v513_v30 }
 0x192   : > { %v502_v12 = vadd.f32 %v501_v61, %v500_v56  ;;  %v515_v33 = vmul.f32 1.442695, %v510_v26 }
 0x194   : > { %v509_v25 = vadd.f32 %v504_v62, %v502_v12  ;;  %707 = vpow2.f32 %v515_v33 }
 0x195   : > { %709 = vpow2.f32 %v517_v34 }
 0x196   : > { %v514_v31 = vsub.f32 0.0, %v509_v25  ;;  %711 = vpow2.f32 %v519_v35 }
 0x197   : > { %713 = vpow2.f32 %v521_v36 }
 0x198   : > { %v523_v37 = vmul.f32 1.442695, %v514_v31 }
 0x19a   : > { %715 = vpow2.f32 %v523_v37 }
 0x19e   : > { %v708_v38 = vpop.eup %707 }
 0x19f   : > { %v710_v39 = vpop.eup %709  ;;  %v525_v42 = vadd.f32 1.0, %v708_v38 }
 0x1a0   : > { %v712_v40 = vpop.eup %711  ;;  %v526_v44 = vadd.f32 1.0, %v710_v39 }
 0x1a1   : > { %v714_v41 = vpop.eup %713  ;;  %v527_v45 = vadd.f32 1.0, %v712_v40  ;;  %717 = vrcp.f32 %v525_v42 }
 0x1a2   : > { %v528_v46 = vadd.f32 1.0, %v714_v41  ;;  %719 = vrcp.f32 %v526_v44 }
 0x1a3   : > { %721 = vrcp.f32 %v527_v45 }
 0x1a4   : > { %v716_v43 = vpop.eup %715  ;;  %723 = vrcp.f32 %v528_v46 }
 0x1a5   : > { %v529_v47 = vadd.f32 1.0, %v716_v43 }
 0x1a7   : > { %725 = vrcp.f32 %v529_v47 }
 0x1ab   : > { %v718_v48 = vpop.eup %717 }
 0x1ac   : > { %v720_v49 = vpop.eup %719 }
 0x1ad   : > { %v722_v50 = vpop.eup %721 }
 0x1ae   : > { %v724_v51 = vpop.eup %723 }
 0x1b1   : > { %v726_v53 = vpop.eup %725 }
 0x1f9   : > { %v538_v52 = vpop.permute.xlu1 %537 }
 0x1fa   : > { %v555_v54 = vadd.f32 %v718_v48, %v538_v52  ;;  %v556_v55 = vadd.f32 %v720_v49, %v538_v52  ;;  %v557_v56 = vadd.f32 %v722_v50, %v538_v52  ;;  %v558_v57 = vadd.f32 %v724_v51, %v538_v52 }
 0x1fb   : > { %v559_v58 = vadd.f32 %v726_v53, %v538_v52 }
 0x1fc   : > { %v575_v59 = vmul.f32 %v555_v54, %v798_v0  ;;  %v576_v60 = vmul.f32 %v556_v55, %v801_v1  ;;  %v577_v61 = vmul.f32 %v557_v56, %v804_v2  ;;  %v578_v62 = vmul.f32 %v558_v57, %v807_v3 }
 0x1fd   : > { %v579_v63 = vmul.f32 %v559_v58, %v810_v4  ;;  %v543_v5 = vpop.permute.xlu1 %542 }
 0x1fe   : > { %595 = vst [vmem:[%s969_s24] sm:$0xff] %v575_v59  ;;  %596 = vst [vmem:[%s969_s24 + $0x8] sm:$0xff] %v576_v60  ;;  %v560_v10 = vadd.f32 %v718_v48, %v543_v5  ;;  %v561_v12 = vadd.f32 %v720_v49, %v543_v5  ;;  %v562_v0 = vadd.f32 %v722_v50, %v543_v5 }
 0x1ff   : > { %597 = vst [vmem:[%s969_s24 + $0x10] sm:$0xff] %v577_v61  ;;  %598 = vst [vmem:[%s969_s24 + $0x18] sm:$0xff] %v578_v62  ;;  %v563_v15 = vadd.f32 %v724_v51, %v543_v5  ;;  %v564_v1 = vadd.f32 %v726_v53, %v543_v5 }
 0x200   : > { %599 = vst.msk [vmem:[%s969_s24 + $0x20] sm:$0xff] %vm303_vm0, %v579_v63  ;;  %v580_v2 = vmul.f32 %v560_v10, %v833_v13  ;;  %v581_v3 = vmul.f32 %v561_v12, %v836_v14  ;;  %v582_v4 = vmul.f32 %v562_v0, %v841_v16 }
 0x201   : > { %v583_v19 = vmul.f32 %v563_v15, %v844_v17  ;;  %v584_v20 = vmul.f32 %v564_v1, %v847_v18  ;;  %v548_v21 = vpop.permute.xlu1 %547 }
 0x202   : > { %600 = vst [vmem:[%s969_s24 + $0x28] sm:$0xff] %v580_v2  ;;  %601 = vst [vmem:[%s969_s24 + $0x30] sm:$0xff] %v581_v3  ;;  %v565_v25 = vadd.f32 %v718_v48, %v548_v21  ;;  %v566_v26 = vadd.f32 %v720_v49, %v548_v21  ;;  %v567_v13 = vadd.f32 %v722_v50, %v548_v21 }
 0x203   : > { %602 = vst [vmem:[%s969_s24 + $0x38] sm:$0xff] %v582_v4  ;;  %603 = vst [vmem:[%s969_s24 + $0x40] sm:$0xff] %v583_v19  ;;  %v568_v28 = vadd.f32 %v724_v51, %v548_v21  ;;  %v569_v14 = vadd.f32 %v726_v53, %v548_v21 }
 0x204   : > { %604 = vst.msk [vmem:[%s969_s24 + $0x48] sm:$0xff] %vm303_vm0, %v584_v20  ;;  %v585_v16 = vmul.f32 %v565_v25, %v815_v6  ;;  %v586_v17 = vmul.f32 %v566_v26, %v818_v7  ;;  %v587_v18 = vmul.f32 %v567_v13, %v821_v8 }
 0x205   : > { %v588_v29 = vmul.f32 %v568_v28, %v824_v9  ;;  %v589_v30 = vmul.f32 %v569_v14, %v828_v11  ;;  %v553_v31 = vpop.permute.xlu1 %552 }
 0x206   : > { %605 = vst [vmem:[%s969_s24 + $0x50] sm:$0xff] %v585_v16  ;;  %606 = vst [vmem:[%s969_s24 + $0x58] sm:$0xff] %v586_v17  ;;  %v570_v33 = vadd.f32 %v718_v48, %v553_v31  ;;  %v571_v6 = vadd.f32 %v720_v49, %v553_v31  ;;  %v572_v34 = vadd.f32 %v722_v50, %v553_v31 }
 0x207   : > { %607 = vst [vmem:[%s969_s24 + $0x60] sm:$0xff] %v587_v18  ;;  %608 = vst [vmem:[%s969_s24 + $0x68] sm:$0xff] %v588_v29  ;;  %v573_v7 = vadd.f32 %v724_v51, %v553_v31  ;;  %v574_v8 = vadd.f32 %v726_v53, %v553_v31 }
 0x208   : > { %609 = vst.msk [vmem:[%s969_s24 + $0x70] sm:$0xff] %vm303_vm0, %v589_v30  ;;  %v590_v9 = vmul.f32 %v570_v33, %v854_v22  ;;  %v591_v11 = vmul.f32 %v571_v6, %v857_v23  ;;  %v592_v35 = vmul.f32 %v572_v34, %v860_v24 }
 0x209   : > { %v593_v36 = vmul.f32 %v573_v7, %v874_v32  ;;  %v594_v37 = vmul.f32 %v574_v8, %v866_v27 }
 0x20a   : > { %610 = vst [vmem:[%s969_s24 + $0x78] sm:$0xff] %v590_v9  ;;  %611 = vst [vmem:[%s969_s24 + $0x80] sm:$0xff] %v591_v11 }
 0x20b   : > { %612 = vst [vmem:[%s969_s24 + $0x88] sm:$0xff] %v592_v35  ;;  %613 = vst [vmem:[%s969_s24 + $0x90] sm:$0xff] %v593_v36 }
 0x20c   : > { %614 = vst.msk [vmem:[%s969_s24 + $0x98] sm:$0xff] %vm303_vm0, %v594_v37 }
 0x20d PF: > { %s18_s26 = sadd.s32 1, %s733_s26  }
 0x20e   : > { %p15_p4 = scmp.ge.s32.totalorder %s18_s26, 4  }
 0x210   :  { %17 = sbr.rel (!%p15_p4) target bundleno = 2 (0x2), region = 78 }

</bundles_post_ra>
